<compile_context>
chip_gen: v6e
topology: v6e:2x2x1
jax: 0.10.0
libtpu: 0.0.40
codegen_flags: <defaults>
</compile_context>

<pallas_src>
from functools import lru_cache, partial

import numpy as np
import jax
import jax.numpy as jnp
from jax.experimental import pallas as pl
from jax.experimental.pallas import tpu as pltpu


# ----------------------------------------------------------------------------
# Hardware-aware sizing helpers.
# ----------------------------------------------------------------------------
def _round_up(x: int, m: int) -> int:
    return ((x + m - 1) // m) * m


def _sublane_pack(dtype) -> int:
    """Sublane packing of the second-minor dim: 8 (4-byte), 16 (2-byte), 32 (1-byte)."""
    return max(8, 32 // max(1, jnp.dtype(dtype).itemsize))


@lru_cache(maxsize=None)
def _vmem_budgets():
    """(vmem_limit_bytes, per-step tile budget), scaled to this generation's VMEM."""
    try:
        cap = int(pltpu.get_tpu_info().vmem_capacity_bytes)
    except Exception:                 # info unavailable -> size for the smallest part (v7x, 64 MiB)
        cap = 64 * 1024 * 1024
    limit = min((cap * 3) // 4, 96 * 1024 * 1024)   # ~96 MiB on v5e/v6e, ~48 MiB on v7x
    budget = min(cap // 4, 40 * 1024 * 1024)        # ~32 MiB on v5e/v6e, ~16 MiB on v7x
    return limit, budget


def _w_dtype(x_dtype):
    """bf16 W for 16-bit float inputs (native MXU rate, half the W bytes); f32 otherwise."""
    if jnp.dtype(x_dtype) in (jnp.dtype(jnp.bfloat16), jnp.dtype(jnp.float16)):
        return jnp.dtype(jnp.bfloat16)
    return jnp.dtype(jnp.float32)


def _pick_batch_tile(B: int, tb_max: int, pack: int) -> int:
    """Batch tile: multiple of the sublane packing, multiple of 256 when large
    (MXU-friendly), and < B whenever possible so the 'parallel' batch axis has
    >= 2 grid steps and v7x can shard it across its two TensorCores."""
    tb = max(pack, min(int(tb_max), 4096))
    tb = (tb // pack) * pack
    if tb >= 512:
        tb = (tb // 256) * 256
    if tb >= B:
        half = _round_up((B + 1) // 2, pack)
        tb = half if half < B else B      # full-extent block when B is too small to split
    return tb


# ----------------------------------------------------------------------------
# Pooling matrix, cached in its final on-device form (padded shape + dtype).
# ----------------------------------------------------------------------------
@lru_cache(maxsize=None)
def _pool_matrix(L: int, D: int, d_pad: int, l_pad: int, dtype_name: str) -> jax.Array:
    """(l_pad, d_pad) pooling matrix. Column i (i < D) holds 1/len over rows
    [floor(i*L/D), ceil((i+1)*L/D)), exactly matching F.adaptive_avg_pool1d.
    Rows >= L and columns >= D are zero (K / lane padding). Cached per config;
    note this pins the device array in HBM for the process lifetime."""
    i = np.arange(D, dtype=np.int64)
    starts = (i * L) // D
    ends = -(-((i + 1) * L) // D)                       # ceil((i+1)*L/D), exact integer math
    j = np.arange(L, dtype=np.int64)[:, None]
    mask = (j >= starts[None, :]) & (j < ends[None, :])
    w = mask.astype(np.float64) / (ends - starts).astype(np.float64)[None, :]
    w = np.pad(w, ((0, l_pad - L), (0, d_pad - D)))
    return jnp.asarray(w.astype(np.float32), dtype=jnp.dtype(dtype_name))


# ----------------------------------------------------------------------------
# Kernels.
# ----------------------------------------------------------------------------
def _resident_kernel(x_ref, w_ref, o_ref):
    # W's BlockSpec index is constant, so the pipeline DMAs it once and keeps it
    # resident; each grid step streams one batch tile of x through the MXU.
    o_ref[...] = jnp.dot(x_ref[...], w_ref[...],
                         preferred_element_type=jnp.float32).astype(o_ref.dtype)


def _ktiled_kernel(x_ref, w_ref, o_ref, acc_ref, *, k_rem: int):
    k = pl.program_id(1)
    nk = pl.num_programs(1)

    @pl.when(k == 0)
    def _():
        acc_ref[...] = jnp.zeros_like(acc_ref)

    x = x_ref[...]
    if k_rem:
        # Ragged last K tile: columns >= k_rem map past the true L. The padded
        # region of a partial block is unspecified (could be NaN), so zero it
        # before it can reach the accumulator (W is already zero-padded in K).
        col = jax.lax.broadcasted_iota(jnp.int32, x.shape, 1)
        keep = jnp.logical_or(col < k_rem, k != nk - 1)
        x = jnp.where(keep, x, jnp.zeros_like(x))

    acc_ref[...] += jnp.dot(x, w_ref[...], preferred_element_type=jnp.float32)

    @pl.when(k == nk - 1)
    def _():
        o_ref[...] = acc_ref[...].astype(o_ref.dtype)


# ----------------------------------------------------------------------------
# Wrappers.
# ----------------------------------------------------------------------------
def _pool_resident(x2d, D, Dp, w_dtype, vmem_limit, budget):
    B, L = x2d.shape
    xi = jnp.dtype(x2d.dtype).itemsize
    wi = jnp.dtype(w_dtype).itemsize
    pack = _sublane_pack(x2d.dtype)
    w = _pool_matrix(L, D, Dp, L, jnp.dtype(w_dtype).name)

    # Double-buffered x/out blocks + (conservatively double-counted) resident W
    # + the f32 dot result must fit the per-step VMEM budget.
    w_vmem = 2 * L * Dp * wi
    per_row = 2 * L * xi + 2 * Dp * xi + Dp * 4
    tb = _pick_batch_tile(B, max(pack, (budget - w_vmem) // per_row), pack)
    grid = (pl.cdiv(B, tb),)

    return pl.pallas_call(
        _resident_kernel,
        out_shape=jax.ShapeDtypeStruct((B, Dp), x2d.dtype),
        grid=grid,
        in_specs=[
            pl.BlockSpec((tb, L), lambda i: (i, 0)),
            pl.BlockSpec((L, Dp), lambda i: (0, 0)),   # constant index -> fetched once, resident
        ],
        out_specs=pl.BlockSpec((tb, Dp), lambda i: (i, 0)),
        compiler_params=pltpu.CompilerParams(
            dimension_semantics=("parallel",),
            vmem_limit_bytes=vmem_limit),
        cost_estimate=pl.CostEstimate(
            flops=int(2 * B * L * Dp), transcendentals=0,
            bytes_accessed=int(B * L * xi + L * Dp * wi + B * Dp * xi)),
    )(x2d, w)


def _pool_ktiled(x2d, D, Dp, w_dtype, vmem_limit, budget, tk_override=None):
    B, L = x2d.shape
    xi = jnp.dtype(x2d.dtype).itemsize
    wi = jnp.dtype(w_dtype).itemsize
    pack = _sublane_pack(x2d.dtype)

    if tk_override is not None:
        tk = int(tk_override)
    else:
        tk = 2048
        while tk > 512 and 2 * tk * Dp * wi > budget // 3:
            tk //= 2
    if tk >= L:
        tk = L                                   # single K step, full-extent block
    else:
        tk = max(128, (tk // 128) * 128)         # lane-aligned K tile
    nk = pl.cdiv(L, tk)
    k_rem = L % tk                               # ragged last tile -> masked in-kernel (no host pad of x)
    Lp = nk * tk

    w = _pool_matrix(L, D, Dp, Lp, jnp.dtype(w_dtype).name)

    w_vmem = 2 * tk * Dp * wi
    per_row = 2 * tk * xi + 2 * Dp * xi + Dp * 4
    tb = _pick_batch_tile(B, max(pack, (budget - w_vmem) // per_row), pack)
    grid = (pl.cdiv(B, tb), nk)

    return pl.pallas_call(
        partial(_ktiled_kernel, k_rem=k_rem),
        out_shape=jax.ShapeDtypeStruct((B, Dp), x2d.dtype),
        grid=grid,
        in_specs=[
            pl.BlockSpec((tb, tk), lambda i, k: (i, k)),
            pl.BlockSpec((tk, Dp), lambda i, k: (k, 0)),
        ],
        out_specs=pl.BlockSpec((tb, Dp), lambda i, k: (i, 0)),
        scratch_shapes=[pltpu.VMEM((tb, Dp), jnp.float32)],
        compiler_params=pltpu.CompilerParams(
            dimension_semantics=("parallel", "arbitrary"),
            vmem_limit_bytes=vmem_limit),
        cost_estimate=pl.CostEstimate(
            flops=int(2 * B * Lp * Dp), transcendentals=0,
            bytes_accessed=int(B * Lp * xi + pl.cdiv(B, tb) * Lp * Dp * wi + B * Dp * xi)),
    )(x2d, w)


# ----------------------------------------------------------------------------
# Public entry point: JAX/Pallas equivalent of MeanMapper(D).forward(features).
# ----------------------------------------------------------------------------
def mean_mapper(features: jax.Array, preprocessing_dim: int, *,
                w_resident_max_bytes=None, tk_override=None) -> jax.Array:
    B = features.shape[0]
    x2d = features.reshape(B, -1)                # same flattening order as torch .reshape
    L = x2d.shape[1]
    D = int(preprocessing_dim)
    Dp = _round_up(D, 128)                       # lane-dense output stores / full-width MXU N
    w_dtype = _w_dtype(x2d.dtype)
    vmem_limit, budget = _vmem_budgets()

    if w_resident_max_bytes is None:
        w_resident_max_bytes = budget // 3
    w_bytes = L * Dp * jnp.dtype(w_dtype).itemsize

    if tk_override is None and w_bytes <= w_resident_max_bytes:
        out = _pool_resident(x2d, D, Dp, w_dtype, vmem_limit, budget)
    else:
        out = _pool_ktiled(x2d, D, Dp, w_dtype, vmem_limit, budget, tk_override)
    return out if Dp == D else out[:, :D]


def _reference(features: jax.Array, preprocessing_dim: int) -> jax.Array:
    """Pure-JAX reference of adaptive_avg_pool1d (same W dtype as the kernel path)."""
    B = features.shape[0]
    x2d = features.reshape(B, -1).astype(jnp.float32)
    L = x2d.shape[1]
    D = int(preprocessing_dim)
    w = _pool_matrix(L, D, D, L, jnp.dtype(_w_dtype(features.dtype)).name).astype(jnp.float32)
    return x2d @ w


if __name__ == "__main__":
    key = jax.random.PRNGKey(0)

    # Small shapes consistent with the module: NCHW feature map, B=2, C=4, 16x16.
    B, C, H, W = 2, 4, 16, 16
    features = jax.random.normal(key, (B, C, H, W), dtype=jnp.float32)

    # 1) L = 1024, D = 128 (D | L, D a multiple of 128) -> resident-W path.
    D = 128
    out = jax.block_until_ready(mean_mapper(features, D))
    assert out.shape == (B, D), out.shape
    np.testing.assert_allclose(np.asarray(out), np.asarray(_reference(features, D)),
                               rtol=1e-4, atol=1e-4)

    # 2) D = 100 (does not divide L, not a multiple of 128) -> padded-D resident path.
    D2 = 100
    out2 = jax.block_until_ready(mean_mapper(features, D2))
    assert out2.shape == (B, D2), out2.shape
    np.testing.assert_allclose(np.asarray(out2), np.asarray(_reference(features, D2)),
                               rtol=1e-4, atol=1e-4)

    # 3) Forced K-tiled fallback with a ragged last K tile (L=1280, tk=512 -> rem 256),
    #    exercising the in-kernel mask + zero-padded W instead of a host-side x pad.
    feat3 = jax.random.normal(jax.random.PRNGKey(0), (2, 5, 16, 16), dtype=jnp.float32)
    out3 = jax.block_until_ready(
        mean_mapper(feat3, 100, w_resident_max_bytes=0, tk_override=512))
    assert out3.shape == (2, 100), out3.shape
    np.testing.assert_allclose(np.asarray(out3), np.asarray(_reference(feat3, 100)),
                               rtol=1e-4, atol=1e-4)

    # 4) bf16 input -> bf16 W on the MXU (bf16 products are exact in f32);
    #    tolerance covers the bf16 quantization of the stored output only.
    feat4 = features.astype(jnp.bfloat16)
    out4 = jax.block_until_ready(mean_mapper(feat4, D))
    assert out4.shape == (B, D), out4.shape
    np.testing.assert_allclose(np.asarray(out4.astype(jnp.float32)),
                               np.asarray(_reference(feat4, D)),
                               rtol=5e-3, atol=5e-3)

    print("KERNEL_OK")
</pallas_src>

<mosaic_0001>
module attributes {stable_mosaic.version = 11 : i64} {
  func.func @_resident_kernel(%arg0: i32, %arg1: memref<2x1024xf32, #tpu.memory_space<vmem>>, %arg2: memref<1024x128xf32, #tpu.memory_space<vmem>>, %arg3: memref<2x128xf32, #tpu.memory_space<vmem>>) attributes {dimension_semantics = [#tpu.dimension_semantics<parallel>], iteration_bounds = array<i64: 1>, scalar_prefetch = 0 : i64, scratch_operands = 0 : i64, tpu.core_type = #tpu.core_type<tc>, window_params = [{transform_indices = @transform_0, window_bounds = array<i64: 2, 1024>}, {pipeline_mode = #tpu.pipeline_mode<synchronous>, transform_indices = @transform_1, window_bounds = array<i64: 1024, 128>}, {transform_indices = @transform_2, window_bounds = array<i64: 2, 128>}]} {
    %c0 = arith.constant 0 : index
    %c0_0 = arith.constant 0 : index
    %0 = vector.load %arg1[%c0, %c0_0] : memref<2x1024xf32, #tpu.memory_space<vmem>>, vector<2x1024xf32>
    %c0_1 = arith.constant 0 : index
    %c0_2 = arith.constant 0 : index
    %1 = vector.load %arg2[%c0_1, %c0_2] : memref<1024x128xf32, #tpu.memory_space<vmem>>, vector<1024x128xf32>
    %cst = arith.constant dense<0.000000e+00> : vector<2x128xf32>
    %2 = tpu.matmul %0, %1, %cst {dimension_numbers = #tpu.dot_dimension_numbers<[1], [0], [0], [1], [0, 0, 1, 1], [], []>} : vector<2x1024xf32>, vector<1024x128xf32>, vector<2x128xf32> -> vector<2x128xf32>
    %c0_3 = arith.constant 0 : index
    %c0_4 = arith.constant 0 : index
    %3 = vector.load %arg3[%c0_3, %c0_4] : memref<2x128xf32, #tpu.memory_space<vmem>>, vector<2x128xf32>
    tpu.vector_store %arg3[%c0_3, %c0_4], %2 {strides = array<i32>} : memref<2x128xf32, #tpu.memory_space<vmem>>, vector<2x128xf32>,
    return
  }
  func.func @transform_0(%arg0: i32) -> (i32, i32) {
    %c0_i32 = arith.constant 0 : i32
    %c0_i32_0 = arith.constant 0 : i32
    return %arg0, %c0_i32 : i32, i32
  }
  func.func @transform_1(%arg0: i32) -> (i32, i32) {
    %c0_i32 = arith.constant 0 : i32
    %c0_i32_0 = arith.constant 0 : i32
    %c0_i32_1 = arith.constant 0 : i32
    return %c0_i32, %c0_i32_0 : i32, i32
  }
  func.func @transform_2(%arg0: i32) -> (i32, i32) {
    %c0_i32 = arith.constant 0 : i32
    %c0_i32_0 = arith.constant 0 : i32
    return %arg0, %c0_i32 : i32, i32
  }
}

</mosaic_0001>

<bundles_post_ra>
// kernel: tpu_custom_call.1
= control target key start
LH: loop header
LB: loop body
LE: loop exit
PB: predicated region body
PF: predicated region fallthrough
CT: control target
= control target key end

     0   :  { %7 = vsyncpa [#allocation3], 0  ;;  %s759_s0 = inlined_call_operand.hbm [shape: f32[2,1024], index: 0, kind: input, shape index: {}]   ;;  %s760_s1 = inlined_call_operand.hbm [shape: f32[1024,128], index: 1, kind: input, shape index: {}]   ;;  %s761_s2 = inlined_call_operand.hbm [shape: f32[2,128], index: 2, kind: output, shape index: {}]  }
   0x1   :  { %8 = vsyncpa [#allocation6], 0 }
   0x2   :  { %9 = vsyncpa [#allocation4], 0  ;;  %s723_s9 = smov [#allocation2]   ;;  %s724_s11 = smov [#allocation5]  }
   0x3   :  { %s16_s10 = sshll.u32 %s723_s9, 4  ;;  %s25_s12 = sshll.u32 %s724_s11, 4  ;;  %s17_s10 = int_to_ptr.vmem [resolvable:$true] %s16_s10  ;;  %s26_s12 = int_to_ptr.vmem [resolvable:$true] %s25_s12 }
   0x4   :  { %s665_s13 = scalar_lea.vmem %s17_s10, 256  ;;  %p670_p1 = scmp.lt.s32.totalorder %s17_s10, %s17_s10 }
   0x5   :  { %p666_p0 = scmp.ne.s32.totalorder %s17_s10, %s665_s13  ;;  %p671_p2 = scmp.lt.s32.totalorder %s665_s13, %s665_s13 }
   0x7   :  { %p672_p3 = por %p671_p2, %p670_p1 }
   0x9   :  { %p673_p4 = pnand %p672_p3, %p666_p0 }
   0xb   :  { %676 = shalt.err (!%p673_p4)
}
   0xc   :  { %19 = dma.hbm_to_vmem [thread:$0]  %s759_s0, 256, %s17_s10, [#allocation3]  }
   0xd   :  { %s685_s16 = scalar_lea.vmem %s26_s12, 16384  ;;  %p690_p6 = scmp.lt.s32.totalorder %s26_s12, %s26_s12 }
   0xe   :  { %p686_p5 = scmp.ne.s32.totalorder %s26_s12, %s685_s16  ;;  %p691_p7 = scmp.lt.s32.totalorder %s685_s16, %s685_s16 }
  0x10   :  { %p692_p8 = por %p691_p7, %p690_p6 }
  0x12   :  { %p693_p9 = pnand %p692_p8, %p686_p5 }
  0x14   :  { %696 = shalt.err (!%p693_p9)
}
  0x15   :  { %s725_s17 = smov 128   ;;  %s726_s18 = smov 8  }
  0x16   :  { %31 = dma.hbm_to_vmem [thread:$0]  %s760_s1, 16384, %s26_s12, [#allocation6], %s725_s17, %s725_s17, %s726_s18  }
  0x17   :  { %717 = dma.done.wait [#allocation3], 256  }
  0x18   :  { %718 = vsyncadd [#allocation3], 4294967040 }
  0x19   :  { %719 = dma.done.wait [#allocation6], 16384  }
  0x1a   :  { %720 = vsyncadd [#allocation6], 4294950912  ;;  %v71_v0 = vld [vmem:[#allocation5 + $0xf8] sm:$0xff]  ;;  %v70_v4 = vld [vmem:[#allocation5 + $0xf0] sm:$0xff]  ;;  %v727_v30 = vmov 1983009808   ;;  %v174_v32 = vlaneseq }
  0x1b   :  { %v103_v1 = vld [vmem:[#allocation5 + $0x1f8] sm:$0xff]  ;;  %509 = vmatprep.subr.mxu0 %v71_v0  ;;  %v102_v5 = vld [vmem:[#allocation5 + $0x1f0] sm:$0xff]  ;;  %v69_v8 = vld [vmem:[#allocation5 + $0xe8] sm:$0xff]  ;;  %v172_v31 = vunpack.c.l.s4 %v727_v30  ;;  %s728_s0 = smov [#allocation7]  }
  0x1c   :  { %v55_v2 = vld [vmem:[#allocation5 + $0x78] sm:$0xff]  ;;  %544 = vmatprep.subr.mxu1 %v103_v1  ;;  %v54_v6 = vld [vmem:[#allocation5 + $0x70] sm:$0xff]  ;;  %v101_v9 = vld [vmem:[#allocation5 + $0x1e8] sm:$0xff]  ;;  %v175_v42 = vshrl.u32 %v174_v32, 7  ;;  %s499_s1 = sshll.u32 %s728_s0, 4  ;;  %s500_s1 = int_to_ptr.vmem [resolvable:$true] %s499_s1 }
  0x1d   :  { %v87_v3 = vld [vmem:[#allocation5 + $0x178] sm:$0xff]  ;;  %510 = vmatpush3.msra.mxu0 %v55_v2  ;;  %v86_v7 = vld [vmem:[#allocation5 + $0x170] sm:$0xff]  ;;  %v53_v10 = vld [vmem:[#allocation5 + $0x68] sm:$0xff]  ;;  %v173_v41 = vunpack.c.0.s8 %v172_v31  ;;  %s697_s21 = scalar_lea.vmem %s500_s1, 32  ;;  %p702_p11 = scmp.lt.s32.totalorder %s500_s1, %s500_s1 }
  0x1e   :  { %545 = vmatpush3.msra.mxu1 %v87_v3  ;;  %511 = vmatprep.subr.mxu0 %v70_v4  ;;  %v85_v11 = vld [vmem:[#allocation5 + $0x168] sm:$0xff]  ;;  %v68_v12 = vld [vmem:[#allocation5 + $0xe0] sm:$0xff]  ;;  %v67_v16 = vld [vmem:[#allocation5 + $0xd8] sm:$0xff]  ;;  %p698_p10 = scmp.ne.s32.totalorder %s500_s1, %s697_s21  ;;  %p703_p12 = scmp.lt.s32.totalorder %s697_s21, %s697_s21 }
  0x1f   :  { %546 = vmatprep.subr.mxu1 %v102_v5  ;;  %512 = vmatpush3.msra.mxu0 %v54_v6  ;;  %v100_v13 = vld [vmem:[#allocation5 + $0x1e0] sm:$0xff]  ;;  %v99_v17 = vld [vmem:[#allocation5 + $0x1d8] sm:$0xff]  ;;  %v66_v20 = vld [vmem:[#allocation5 + $0xd0] sm:$0xff]  ;;  %v750_v51 = vsub.s32 %v173_v41, %v175_v42 }
  0x20   :  { %547 = vmatpush3.msra.mxu1 %v86_v7  ;;  %513 = vmatprep.subr.mxu0 %v69_v8  ;;  %v52_v14 = vld [vmem:[#allocation5 + $0x60] sm:$0xff]  ;;  %v51_v18 = vld [vmem:[#allocation5 + $0x58] sm:$0xff]  ;;  %v98_v21 = vld [vmem:[#allocation5 + $0x1d0] sm:$0xff]  ;;  %p704_p13 = por %p703_p12, %p702_p11 }
  0x21   :  { %548 = vmatprep.subr.mxu1 %v101_v9  ;;  %v84_v15 = vld [vmem:[#allocation5 + $0x160] sm:$0xff]  ;;  %514 = vmatpush3.msra.mxu0 %v53_v10  ;;  %v83_v19 = vld [vmem:[#allocation5 + $0x158] sm:$0xff]  ;;  %v50_v22 = vld [vmem:[#allocation5 + $0x50] sm:$0xff] }
  0x22   :  { %549 = vmatpush3.msra.mxu1 %v85_v11  ;;  %515 = vmatprep.subr.mxu0 %v68_v12  ;;  %v82_v23 = vld [vmem:[#allocation5 + $0x150] sm:$0xff]  ;;  %v65_v24 = vld [vmem:[#allocation5 + $0xc8] sm:$0xff]  ;;  %v64_v28 = vld [vmem:[#allocation5 + $0xc0] sm:$0xff]  ;;  %p705_p0 = pnand %p704_p13, %p698_p10 }
  0x23   :  { %550 = vmatprep.subr.mxu1 %v100_v13  ;;  %516 = vmatpush3.msra.mxu0 %v52_v14  ;;  %v97_v25 = vld [vmem:[#allocation5 + $0x1c8] sm:$0xff]  ;;  %v96_v29 = vld [vmem:[#allocation5 + $0x1c0] sm:$0xff]  ;;  %v63_v35 = vld [vmem:[#allocation5 + $0xb8] sm:$0xff] }
  0x24   :  { %551 = vmatpush3.msra.mxu1 %v84_v15  ;;  %517 = vmatprep.subr.mxu0 %v67_v16  ;;  %v49_v26 = vld [vmem:[#allocation5 + $0x48] sm:$0xff]  ;;  %v48_v33 = vld [vmem:[#allocation5 + $0x40] sm:$0xff]  ;;  %v95_v36 = vld [vmem:[#allocation5 + $0x1b8] sm:$0xff] }
  0x25   :  { %552 = vmatprep.subr.mxu1 %v99_v17  ;;  %518 = vmatpush3.msra.mxu0 %v51_v18  ;;  %v81_v27 = vld [vmem:[#allocation5 + $0x148] sm:$0xff]  ;;  %v80_v34 = vld [vmem:[#allocation5 + $0x140] sm:$0xff]  ;;  %v47_v37 = vld [vmem:[#allocation5 + $0x38] sm:$0xff] }
  0x26   :  { %553 = vmatpush3.msra.mxu1 %v83_v19  ;;  %519 = vmatprep.subr.mxu0 %v66_v20  ;;  %v79_v38 = vld [vmem:[#allocation5 + $0x138] sm:$0xff]  ;;  %v62_v39 = vld [vmem:[#allocation5 + $0xb0] sm:$0xff]  ;;  %v61_v45 = vld [vmem:[#allocation5 + $0xa8] sm:$0xff] }
  0x27   :  { %554 = vmatprep.subr.mxu1 %v98_v21  ;;  %520 = vmatpush3.msra.mxu0 %v50_v22  ;;  %v94_v40 = vld [vmem:[#allocation5 + $0x1b0] sm:$0xff]  ;;  %v93_v46 = vld [vmem:[#allocation5 + $0x1a8] sm:$0xff]  ;;  %v60_v49 = vld [vmem:[#allocation5 + $0xa0] sm:$0xff] }
  0x28   :  { %555 = vmatpush3.msra.mxu1 %v82_v23  ;;  %521 = vmatprep.subr.mxu0 %v65_v24  ;;  %v46_v43 = vld [vmem:[#allocation5 + $0x30] sm:$0xff]  ;;  %v45_v47 = vld [vmem:[#allocation5 + $0x28] sm:$0xff]  ;;  %v92_v50 = vld [vmem:[#allocation5 + $0x1a0] sm:$0xff] }
  0x29   :  { %556 = vmatprep.subr.mxu1 %v97_v25  ;;  %522 = vmatpush3.msra.mxu0 %v49_v26  ;;  %v78_v44 = vld [vmem:[#allocation5 + $0x130] sm:$0xff]  ;;  %v77_v48 = vld [vmem:[#allocation5 + $0x128] sm:$0xff]  ;;  %v44_v52 = vld [vmem:[#allocation5 + $0x20] sm:$0xff] }
  0x2a   :  { %557 = vmatpush3.msra.mxu1 %v81_v27  ;;  %523 = vmatprep.subr.mxu0 %v64_v28  ;;  %v76_v53 = vld [vmem:[#allocation5 + $0x120] sm:$0xff]  ;;  %v38_v54 = vld [vmem:[#allocation2] sm:$0xff]  ;;  %v59_v55 = vld [vmem:[#allocation5 + $0x98] sm:$0xff] }
  0x2b   :  { %558 = vmatprep.subr.mxu1 %v96_v29  ;;  %524 = vmatpush3.msra.mxu0 %v48_v33  ;;  %v91_v56 = vld [vmem:[#allocation5 + $0x198] sm:$0xff]  ;;  %v170_v57 = vcombine.high %v38_v54, %v38_v54  ;;  %v58_v60 = vld [vmem:[#allocation5 + $0x90] sm:$0xff]  ;;  %v177_v62 = vrot.slane %v38_v54, %v750_v51  ;;  %v57_v2 = vld [vmem:[#allocation5 + $0x88] sm:$0xff] }
  0x2c   :  { %559 = vmatpush3.msra.mxu1 %v80_v34  ;;  %525 = vmatprep.subr.mxu0 %v63_v35  ;;  %v43_v58 = vld [vmem:[#allocation5 + $0x18] sm:$0xff]  ;;  %v90_v61 = vld [vmem:[#allocation5 + $0x190] sm:$0xff]  ;;  %v89_v3 = vld [vmem:[#allocation5 + $0x188] sm:$0xff] }
  0x2d   :  { %560 = vmatprep.subr.mxu1 %v95_v36  ;;  %526 = vmatpush3.msra.mxu0 %v47_v37  ;;  %v75_v59 = vld [vmem:[#allocation5 + $0x118] sm:$0xff]  ;;  %v42_v63 = vld [vmem:[#allocation5 + $0x10] sm:$0xff]  ;;  %v184_v1 = vrot.slane %v170_v57, %v750_v51  ;;  %v41_v4 = vld [vmem:[#allocation5 + $0x8] sm:$0xff]  ;;  %v185_v8 = vcombine.high %v177_v62, %v177_v62 }
  0x2e   :  { %561 = vmatpush3.msra.mxu1 %v79_v38  ;;  %527 = vmatprep.subr.mxu0 %v62_v39  ;;  %v74_v0 = vld [vmem:[#allocation5 + $0x110] sm:$0xff]  ;;  %v73_v5 = vld [vmem:[#allocation5 + $0x108] sm:$0xff]  ;;  %v56_v6 = vld [vmem:[#allocation5 + $0x80] sm:$0xff] }
  0x2f   :  { %562 = vmatprep.subr.mxu1 %v94_v40  ;;  %528 = vmatpush3.msra.mxu0 %v46_v43  ;;  %v88_v7 = vld [vmem:[#allocation5 + $0x180] sm:$0xff]  ;;  %v186_v10 = vcombine.high %v184_v1, %v184_v1  ;;  %v135_v12 = vld [vmem:[#allocation5 + $0x2f8] sm:$0xff]  ;;  %v134_v16 = vld [vmem:[#allocation5 + $0x2f0] sm:$0xff] }
  0x30   :  { %563 = vmatpush3.msra.mxu1 %v78_v44  ;;  %529 = vmatprep.subr.mxu0 %v61_v45  ;;  %v40_v9 = vld [vmem:[#allocation5] sm:$0xff]  ;;  %v167_v13 = vld [vmem:[#allocation5 + $0x3f8] sm:$0xff]  ;;  %v166_v17 = vld [vmem:[#allocation5 + $0x3f0] sm:$0xff] }
  0x31   :  { %564 = vmatprep.subr.mxu1 %v93_v46  ;;  %530 = vmatpush3.msra.mxu0 %v45_v47  ;;  %v72_v11 = vld [vmem:[#allocation5 + $0x100] sm:$0xff]  ;;  %v119_v14 = vld [vmem:[#allocation5 + $0x278] sm:$0xff]  ;;  %v118_v18 = vld [vmem:[#allocation5 + $0x270] sm:$0xff] }
  0x32   :  { %565 = vmatpush3.msra.mxu1 %v77_v48  ;;  %531 = vmatprep.subr.mxu0 %v60_v49  ;;  %v151_v15 = vld [vmem:[#allocation5 + $0x378] sm:$0xff]  ;;  %v150_v19 = vld [vmem:[#allocation5 + $0x370] sm:$0xff]  ;;  %v133_v20 = vld [vmem:[#allocation5 + $0x2e8] sm:$0xff] }
  0x33   :  { %566 = vmatprep.subr.mxu1 %v92_v50  ;;  %532 = vmatpush3.msra.mxu0 %v44_v52  ;;  %v165_v21 = vld [vmem:[#allocation5 + $0x3e8] sm:$0xff]  ;;  %v132_v24 = vld [vmem:[#allocation5 + $0x2e0] sm:$0xff]  ;;  %v131_v28 = vld [vmem:[#allocation5 + $0x2d8] sm:$0xff] }
  0x34   :  { %567 = vmatpush3.msra.mxu1 %v76_v53  ;;  %533 = vmatprep.subr.mxu0 %v59_v55  ;;  %v117_v22 = vld [vmem:[#allocation5 + $0x268] sm:$0xff]  ;;  %v164_v25 = vld [vmem:[#allocation5 + $0x3e0] sm:$0xff]  ;;  %v163_v29 = vld [vmem:[#allocation5 + $0x3d8] sm:$0xff] }
  0x35   :  { %568 = vmatprep.subr.mxu1 %v91_v56  ;;  %534 = vmatpush3.msra.mxu0 %v43_v58  ;;  %v149_v23 = vld [vmem:[#allocation5 + $0x368] sm:$0xff]  ;;  %v116_v26 = vld [vmem:[#allocation5 + $0x260] sm:$0xff]  ;;  %v115_v30 = vld [vmem:[#allocation5 + $0x258] sm:$0xff] }
  0x36   :  { %569 = vmatpush3.msra.mxu1 %v75_v59  ;;  %535 = vmatprep.subr.mxu0 %v58_v60  ;;  %v148_v27 = vld [vmem:[#allocation5 + $0x360] sm:$0xff]  ;;  %v147_v31 = vld [vmem:[#allocation5 + $0x358] sm:$0xff]  ;;  %v130_v32 = vld [vmem:[#allocation5 + $0x2d0] sm:$0xff] }
  0x37   :  { %570 = vmatprep.subr.mxu1 %v90_v61  ;;  %536 = vmatpush3.msra.mxu0 %v42_v63  ;;  %v162_v33 = vld [vmem:[#allocation5 + $0x3d0] sm:$0xff]  ;;  %v129_v36 = vld [vmem:[#allocation5 + $0x2c8] sm:$0xff]  ;;  %v128_v40 = vld [vmem:[#allocation5 + $0x2c0] sm:$0xff] }
  0x38   :  { %571 = vmatpush3.msra.mxu1 %v74_v0  ;;  %537 = vmatprep.subr.mxu0 %v57_v2  ;;  %v114_v34 = vld [vmem:[#allocation5 + $0x250] sm:$0xff]  ;;  %v161_v37 = vld [vmem:[#allocation5 + $0x3c8] sm:$0xff]  ;;  %v160_v41 = vld [vmem:[#allocation5 + $0x3c0] sm:$0xff] }
  0x39   :  { %572 = vmatprep.subr.mxu1 %v89_v3  ;;  %538 = vmatpush3.msra.mxu0 %v41_v4  ;;  %v146_v35 = vld [vmem:[#allocation5 + $0x350] sm:$0xff]  ;;  %v113_v38 = vld [vmem:[#allocation5 + $0x248] sm:$0xff]  ;;  %v112_v42 = vld [vmem:[#allocation5 + $0x240] sm:$0xff] }
  0x3a   :  { %573 = vmatpush3.msra.mxu1 %v73_v5  ;;  %539 = vmatprep.subr.mxu0 %v56_v6  ;;  %v145_v39 = vld [vmem:[#allocation5 + $0x348] sm:$0xff]  ;;  %v144_v43 = vld [vmem:[#allocation5 + $0x340] sm:$0xff]  ;;  %v127_v44 = vld [vmem:[#allocation5 + $0x2b8] sm:$0xff] }
  0x3b   :  { %574 = vmatprep.subr.mxu1 %v88_v7  ;;  %540 = vmatpush3.msra.mxu0 %v40_v9  ;;  %v159_v45 = vld [vmem:[#allocation5 + $0x3b8] sm:$0xff]  ;;  %v126_v48 = vld [vmem:[#allocation5 + $0x2b0] sm:$0xff]  ;;  %v125_v53 = vld [vmem:[#allocation5 + $0x2a8] sm:$0xff] }
  0x3c   :  { %276 = vmatprep.mubr.f32.mxu0 %v185_v8  ;;  %575 = vmatpush3.msra.mxu1 %v72_v11  ;;  %v111_v46 = vld [vmem:[#allocation5 + $0x238] sm:$0xff]  ;;  %v158_v49 = vld [vmem:[#allocation5 + $0x3b0] sm:$0xff]  ;;  %v157_v54 = vld [vmem:[#allocation5 + $0x3a8] sm:$0xff] }
  0x3d   :  { %346 = vmatprep.mubr.f32.mxu1 %v186_v10  ;;  %277 = vmatmul.mubr.f32.vlgmr.msra.gmra.mxu0 %v177_v62  ;;  %v143_v47 = vld [vmem:[#allocation5 + $0x338] sm:$0xff]  ;;  %v110_v50 = vld [vmem:[#allocation5 + $0x230] sm:$0xff]  ;;  %v109_v56 = vld [vmem:[#allocation5 + $0x228] sm:$0xff] }
  0x3e   :  { %347 = vmatmul.mubr.f32.vlgmr.msra.gmra.mxu1 %v184_v1  ;;  %579 = vmatprep.subr.mxu0 %v135_v12  ;;  %v142_v52 = vld [vmem:[#allocation5 + $0x330] sm:$0xff]  ;;  %v39_v55 = vld [vmem:[#allocation2 + $0x8] sm:$0xff]  ;;  %v141_v57 = vld [vmem:[#allocation5 + $0x328] sm:$0xff] }
  0x3f   :  { %614 = vmatprep.subr.mxu1 %v167_v13  ;;  %580 = vmatpush3.msra.mxu0 %v119_v14  ;;  %v124_v58 = vld [vmem:[#allocation5 + $0x2a0] sm:$0xff]  ;;  %v187_v62 = vcombine.high %v39_v55, %v39_v55  ;;  %v123_v63 = vld [vmem:[#allocation5 + $0x298] sm:$0xff]  ;;  %v122_v3 = vld [vmem:[#allocation5 + $0x290] sm:$0xff]  ;;  %v194_v5 = vrot.slane %v39_v55, %v750_v51 }
  0x40   :  { %615 = vmatpush3.msra.mxu1 %v151_v15  ;;  %581 = vmatprep.subr.mxu0 %v134_v16  ;;  %v156_v59 = vld [vmem:[#allocation5 + $0x3a0] sm:$0xff]  ;;  %v155_v0 = vld [vmem:[#allocation5 + $0x398] sm:$0xff]  ;;  %v154_v4 = vld [vmem:[#allocation5 + $0x390] sm:$0xff] }
  0x41   :  { %616 = vmatprep.subr.mxu1 %v166_v17  ;;  %582 = vmatpush3.msra.mxu0 %v118_v18  ;;  %v108_v60 = vld [vmem:[#allocation5 + $0x220] sm:$0xff]  ;;  %v107_v1 = vld [vmem:[#allocation5 + $0x218] sm:$0xff]  ;;  %v106_v6 = vld [vmem:[#allocation5 + $0x210] sm:$0xff]  ;;  %v201_v8 = vrot.slane %v187_v62, %v750_v51  ;;  %v202_v15 = vcombine.high %v194_v5, %v194_v5 }
  0x42   :  { %617 = vmatpush3.msra.mxu1 %v150_v19  ;;  %583 = vmatprep.subr.mxu0 %v133_v20  ;;  %v140_v61 = vld [vmem:[#allocation5 + $0x320] sm:$0xff]  ;;  %v139_v2 = vld [vmem:[#allocation5 + $0x318] sm:$0xff]  ;;  %v138_v7 = vld [vmem:[#allocation5 + $0x310] sm:$0xff] }
  0x43   :  { %618 = vmatprep.subr.mxu1 %v165_v21  ;;  %584 = vmatpush3.msra.mxu0 %v117_v22  ;;  %v121_v9 = vld [vmem:[#allocation5 + $0x288] sm:$0xff]  ;;  %v120_v13 = vld [vmem:[#allocation5 + $0x280] sm:$0xff]  ;;  %v203_v17 = vcombine.high %v201_v8, %v201_v8 }
  0x44   :  { %619 = vmatpush3.msra.mxu1 %v149_v23  ;;  %585 = vmatprep.subr.mxu0 %v132_v24  ;;  %v153_v10 = vld [vmem:[#allocation5 + $0x388] sm:$0xff]  ;;  %v152_v14 = vld [vmem:[#allocation5 + $0x380] sm:$0xff] }
  0x45   :  { %620 = vmatprep.subr.mxu1 %v164_v25  ;;  %586 = vmatpush3.msra.mxu0 %v116_v26  ;;  %v105_v11 = vld [vmem:[#allocation5 + $0x208] sm:$0xff]  ;;  %v104_v16 = vld [vmem:[#allocation5 + $0x200] sm:$0xff] }
  0x46   :  { %621 = vmatpush3.msra.mxu1 %v148_v27  ;;  %587 = vmatprep.subr.mxu0 %v131_v28  ;;  %v137_v12 = vld [vmem:[#allocation5 + $0x308] sm:$0xff]  ;;  %v136_v51 = vld [vmem:[#allocation5 + $0x300] sm:$0xff] }
  0x47   :  { %622 = vmatprep.subr.mxu1 %v163_v29  ;;  %588 = vmatpush3.msra.mxu0 %v115_v30 }
  0x48   :  { %623 = vmatpush3.msra.mxu1 %v147_v31  ;;  %589 = vmatprep.subr.mxu0 %v130_v32 }
  0x49   :  { %624 = vmatprep.subr.mxu1 %v162_v33  ;;  %590 = vmatpush3.msra.mxu0 %v114_v34 }
  0x4a   :  { %625 = vmatpush3.msra.mxu1 %v146_v35  ;;  %591 = vmatprep.subr.mxu0 %v129_v36 }
  0x4b   :  { %626 = vmatprep.subr.mxu1 %v161_v37  ;;  %592 = vmatpush3.msra.mxu0 %v113_v38 }
  0x4c   :  { %627 = vmatpush3.msra.mxu1 %v145_v39  ;;  %593 = vmatprep.subr.mxu0 %v128_v40 }
  0x4d   :  { %628 = vmatprep.subr.mxu1 %v160_v41  ;;  %594 = vmatpush3.msra.mxu0 %v112_v42 }
  0x4e   :  { %629 = vmatpush3.msra.mxu1 %v144_v43  ;;  %595 = vmatprep.subr.mxu0 %v127_v44 }
  0x4f   :  { %630 = vmatprep.subr.mxu1 %v159_v45  ;;  %596 = vmatpush3.msra.mxu0 %v111_v46 }
  0x50   :  { %631 = vmatpush3.msra.mxu1 %v143_v47  ;;  %597 = vmatprep.subr.mxu0 %v126_v48 }
  0x51   :  { %632 = vmatprep.subr.mxu1 %v158_v49  ;;  %598 = vmatpush3.msra.mxu0 %v110_v50 }
  0x52   :  { %633 = vmatpush3.msra.mxu1 %v142_v52  ;;  %599 = vmatprep.subr.mxu0 %v125_v53 }
  0x53   :  { %634 = vmatprep.subr.mxu1 %v157_v54  ;;  %600 = vmatpush3.msra.mxu0 %v109_v56 }
  0x54   :  { %635 = vmatpush3.msra.mxu1 %v141_v57  ;;  %601 = vmatprep.subr.mxu0 %v124_v58 }
  0x55   :  { %636 = vmatprep.subr.mxu1 %v156_v59  ;;  %602 = vmatpush3.msra.mxu0 %v108_v60 }
  0x56   :  { %637 = vmatpush3.msra.mxu1 %v140_v61  ;;  %603 = vmatprep.subr.mxu0 %v123_v63 }
  0x57   :  { %638 = vmatprep.subr.mxu1 %v155_v0  ;;  %604 = vmatpush3.msra.mxu0 %v107_v1 }
  0x58   :  { %639 = vmatpush3.msra.mxu1 %v139_v2  ;;  %605 = vmatprep.subr.mxu0 %v122_v3 }
  0x59   :  { %640 = vmatprep.subr.mxu1 %v154_v4  ;;  %606 = vmatpush3.msra.mxu0 %v106_v6 }
  0x5a   :  { %641 = vmatpush3.msra.mxu1 %v138_v7  ;;  %607 = vmatprep.subr.mxu0 %v121_v9 }
  0x5b   :  { %642 = vmatprep.subr.mxu1 %v153_v10  ;;  %608 = vmatpush3.msra.mxu0 %v105_v11 }
  0x5c   :  { %643 = vmatpush3.msra.mxu1 %v137_v12  ;;  %609 = vmatprep.subr.mxu0 %v120_v13 }
  0x5d   :  { %644 = vmatprep.subr.mxu1 %v152_v14  ;;  %610 = vmatpush3.msra.mxu0 %v104_v16 }
  0x5e   :  { %416 = vmatprep.mubr.f32.mxu0 %v202_v15  ;;  %645 = vmatpush3.msra.mxu1 %v136_v51 }
  0x5f   :  { %486 = vmatprep.mubr.f32.mxu1 %v203_v17  ;;  %417 = vmatmul.mubr.f32.vlgmr.msra.gmra.mxu0 %v194_v5 }
  0x60   :  { %487 = vmatmul.mubr.f32.vlgmr.msra.gmra.mxu1 %v201_v8 }
  0xfd   :  { %v541_v18 = vpop.f32.mrf.mxu0 }
  0xfe   :  { %v576_v19 = vpop.f32.mrf.mxu1 }
  0xff   :  { %v542_v20 = vpop.f32.mrf.mxu0 }
 0x100   :  { %v577_v21 = vpop.f32.mrf.mxu1  ;;  %v543_v22 = vadd.f32 %v542_v20, %v541_v18 }
 0x101   :  { %v578_v23 = vadd.f32 %v577_v21, %v576_v19 }
 0x103   :  { %v349_v28 = vadd.f32 %v578_v23, %v543_v22 }
 0x11f   :  { %v611_v24 = vpop.f32.mrf.mxu0 }
 0x120   :  { %v646_v25 = vpop.f32.mrf.mxu1 }
 0x121   :  { %v612_v26 = vpop.f32.mrf.mxu0 }
 0x122   :  { %v647_v27 = vpop.f32.mrf.mxu1  ;;  %v613_v29 = vadd.f32 %v612_v26, %v611_v24 }
 0x123   :  { %v648_v31 = vadd.f32 %v647_v27, %v646_v25 }
 0x124   :  { %v419_v30 = vadd.f32 %v613_v29, %v349_v28 }
 0x126   :  { %v489_v32 = vadd.f32 %v648_v31, %v419_v30 }
 0x128   :  { %492 = vst [vmem:[#allocation7] sm:$0x3] %v489_v32 }
 0x129   :  { %708 = shalt.err (!%p705_p0)
}
 0x12a   :  { %502 = dma.vmem_to_hbm [thread:$0]  %s500_s1, 32, %s761_s2, [#allocation4]  }
 0x12b   :  { %721 = dma.done.wait [#allocation4], 32  }
 0x12c   :  { %722 = vsyncadd [#allocation4], 4294967264 }
 0x12d   :  { %506 = vsyncpa [#allocation3], 1 }
 0x12e   :  { %507 = vsyncpa [#allocation6], 1 }
 0x12f   :  { %508 = vsyncpa [#allocation4], 1 }

</bundles_post_ra>
